<compile_context>
chip_gen: v7x
topology: tpu7x:2x2x1
jax: 0.10.0
libtpu: 0.0.40
codegen_flags: <defaults>
</compile_context>

<pallas_src>
import math
from functools import partial

import jax
import jax.numpy as jnp
import numpy as np
from jax import lax
from jax.experimental import pallas as pl
from jax.experimental.pallas import tpu as pltpu

DILATIONS = (1, 2, 4, 8)
KERNEL_SIZE = 3


def get_kernel_size(channel):
    k = int(abs((math.log2(channel) + 1) / 2))
    return k if k % 2 else k + 1


def _cdiv(a, b):
    return -(-a // b)


# ----------------------------------------------------------------------------
# Pallas kernel: one block of Bblk batch segments per grid step.
# Layout inside the kernel: channels -> sublanes, (batch-segment, time) -> lanes.
# All heavy math runs on the MXU; accumulation stays f32.
# ----------------------------------------------------------------------------
def _residual_temporal_conv_kernel(
    x_ref,       # (1, C_in, L + 2*Pmax)  padded batch segments folded into lanes (f32)
    tap_w_ref,   # (n_shift, C_out, C_in) folded dw*pw*BN weight per unique time shift
    b_ref,       # (C_out, 1)             folded bias (dw bias + pw bias + BN shift)
    eca_ref,     # (C_out, C_out)         banded ECA matrix
    sum_ref,     # (L, Bblk)              per-segment (1/T) mean selector (masks halo lanes)
    bc_ref,      # (Bblk, L)              per-segment gate broadcast selector
    *rest,       # [res_w (C_out,C_in), res_b (C_out,1)] if has_residual, then out_ref
    shifts,
    pmax,
    l_out,
    has_residual,
    mxu_dtype,
):
    if has_residual:
        res_w_ref, res_b_ref, out_ref = rest
    else:
        (out_ref,) = rest

    x2d = x_ref[0]                                           # (C_in, L + 2*Pmax), f32
    x_mx = x2d if mxu_dtype is None else x2d.astype(mxu_dtype)

    # --- depthwise + pointwise + BN as n_shift accumulated MXU matmuls over shifted slices
    acc = None
    for idx, s in enumerate(shifts):                         # static python loop (unrolled)
        contrib = jnp.dot(tap_w_ref[idx], x_mx[:, s:s + l_out],
                          preferred_element_type=jnp.float32)
        acc = contrib if acc is None else acc + contrib
    y = jnp.maximum(acc + b_ref[...], 0.0)                   # (C_out, L), f32

    # --- ECA: per-segment mean, banded ECA conv, gate broadcast — three small MXU matmuls
    m = jnp.dot(y, sum_ref[...], preferred_element_type=jnp.float32)        # (C_out, Bblk)
    gate = jax.nn.sigmoid(jnp.dot(eca_ref[...], m,
                                  preferred_element_type=jnp.float32))      # (C_out, Bblk)
    gate_full = jnp.dot(gate, bc_ref[...],
                        preferred_element_type=jnp.float32)                 # (C_out, L)

    # --- residual 1x1 conv (skipped entirely for the identity case)
    if has_residual:
        r = jnp.dot(res_w_ref[...], x_mx[:, pmax:pmax + l_out],
                    preferred_element_type=jnp.float32) + res_b_ref[...]
    else:
        r = x2d[:, pmax:pmax + l_out]                        # identity residual, exact f32

    out_ref[0] = (y * gate_full + r).astype(out_ref.dtype)


# ----------------------------------------------------------------------------
# bblk selection: lane-dense output (>=128 lanes, preferably a multiple of 128),
# but keep >=2 grid steps when the batch allows (v7x megacore).
# ----------------------------------------------------------------------------
def _choose_bblk(b, tp, lane_target):
    align = 128 // math.gcd(tp, 128)
    min_aligned = max(align, _cdiv(_cdiv(128, tp), align) * align)
    if min_aligned > 2 * max(b, 1):
        # a 128-multiple lane width would more than double the batch with fake segments;
        # accept a masked tail store instead
        align = 1
    min_bblk = _cdiv(_cdiv(128, tp), align) * align
    tgt_bblk = max(min_bblk, (lane_target // tp) // align * align)
    bblk = max(min(tgt_bblk, _cdiv(b, align) * align), min_bblk)
    if _cdiv(b, bblk) == 1 and bblk > align:
        half = max(min_bblk, _cdiv(_cdiv(b, 2), align) * align)
        if _cdiv(b, half) >= 2:
            bblk = half                                      # give both v7x TCs work
    return bblk


# ----------------------------------------------------------------------------
# Wrapper: builds the lane-folded slab, folds dw/pw/BN/biases into per-shift weights,
# builds the banded ECA matrix and selectors, and unpacks back to (B, C_out, T).
# ----------------------------------------------------------------------------
def residual_temporal_conv(x, params, dilations=DILATIONS, kernel_size=KERNEL_SIZE,
                           lane_target=1024, mxu_dtype=jnp.bfloat16, out_dtype=None):
    b, c_in, t_len = x.shape
    nb = len(dilations)
    c_out_b = params["pw_w"].shape[1]
    c_out = nb * c_out_b
    k_eca = params["eca_w"].shape[1]
    out_dtype = x.dtype if out_dtype is None else out_dtype

    pmax = max((kernel_size - 1) * d // 2 for d in dilations)
    tp = t_len + 2 * pmax                  # per-segment padded length
    bblk = _choose_bblk(b, tp, lane_target)
    nblk = _cdiv(b, bblk)
    b_pad = nblk * bblk
    l_out = bblk * tp
    l_in = l_out + 2 * pmax

    # ---- input slab (B folded into lanes): each segment = [pmax 0s | x_b | pmax 0s]
    xpad = jnp.pad(x.astype(jnp.float32), ((0, b_pad - b), (0, 0), (pmax, pmax)))
    x_slab = (xpad.reshape(nblk, bblk, c_in, tp)
                  .transpose(0, 2, 1, 3)
                  .reshape(nblk, c_in, bblk * tp))
    x_slab = jnp.pad(x_slab, ((0, 0), (0, 0), (0, 2 * pmax)))   # halo tail for shifted reads

    # ---- fold depthwise + pointwise + BN into one (C_out, C_in) weight per unique shift
    pw_w = params["pw_w"].astype(jnp.float32)
    dw_w = params["dw_w"].astype(jnp.float32)
    bn_scale = params["bn_scale"].astype(jnp.float32)
    shift_w = {}
    for br, d in enumerate(dilations):
        pad = (kernel_size - 1) * d // 2
        base = bn_scale[br] * pw_w[br]                           # (C_out_b, C_in)
        for j in range(kernel_size):
            s = pmax - pad + j * d                               # static lane shift
            w_full = jnp.zeros((c_out, c_in), jnp.float32).at[
                br * c_out_b:(br + 1) * c_out_b, :].set(base * dw_w[br, :, j][None, :])
            shift_w[s] = (shift_w[s] + w_full) if s in shift_w else w_full
    shifts = tuple(sorted(shift_w))
    tap_w = jnp.stack([shift_w[s] for s in shifts], axis=0)      # (n_shift, C_out, C_in)

    b_fused = jnp.concatenate(
        [bn_scale[br] * (params["pw_b"][br].astype(jnp.float32)
                         + pw_w[br] @ params["dw_b"][br].astype(jnp.float32))
         + params["bn_shift"][br].astype(jnp.float32) for br in range(nb)],
        axis=0)                                                  # (C_out, 1) f32

    # ---- banded ECA matrix: gate = sigmoid(E @ mean)
    pad_e = (k_eca - 1) // 2
    chan = jnp.arange(c_out)
    diff = chan[None, :] - chan[:, None]
    eca_mat = jnp.zeros((c_out, c_out), jnp.float32)
    for j in range(k_eca):
        eca_mat = eca_mat + jnp.where(diff == (j - pad_e),
                                      params["eca_w"][0, j].astype(jnp.float32), 0.0)

    # ---- per-segment mean / gate-broadcast selectors (also mask halo + fake-batch lanes)
    sum_np = np.zeros((l_out, bblk), np.float32)
    bc_np = np.zeros((bblk, l_out), np.float32)
    for seg in range(bblk):
        sum_np[seg * tp: seg * tp + t_len, seg] = 1.0 / t_len
        bc_np[seg, seg * tp: seg * tp + t_len] = 1.0
    sum_mat = jnp.asarray(sum_np)
    bc_mat = jnp.asarray(bc_np)

    has_residual = params.get("res_w", None) is not None
    if mxu_dtype is not None:
        tap_w = tap_w.astype(mxu_dtype)

    inputs = [x_slab, tap_w, b_fused, eca_mat, sum_mat, bc_mat]
    if has_residual:
        res_w = params["res_w"].astype(jnp.float32)
        if mxu_dtype is not None:
            res_w = res_w.astype(mxu_dtype)
        res_b = params["res_b"].reshape(c_out, 1).astype(jnp.float32)
        inputs += [res_w, res_b]

    def whole(a):
        nd = a.ndim
        return pl.BlockSpec(a.shape, lambda g, _nd=nd: (0,) * _nd)

    in_specs = ([pl.BlockSpec((1, c_in, l_in), lambda g: (g, 0, 0))]
                + [whole(a) for a in inputs[1:]])

    kernel = partial(_residual_temporal_conv_kernel, shifts=shifts, pmax=pmax,
                     l_out=l_out, has_residual=has_residual, mxu_dtype=mxu_dtype)

    # VMEM budget: double-buffered I/O + double-buffered constants + a few f32 temps.
    const_bytes = sum(int(np.prod(a.shape)) * a.dtype.itemsize for a in inputs[1:])
    io_bytes = (c_in * l_in * 4 + c_out * l_out * np.dtype(out_dtype).itemsize) * 2
    tmp_bytes = 6 * c_out * l_out * 4
    vmem_limit = int(min(64 * 2 ** 20,
                         max(32 * 2 ** 20, 2 * (2 * const_bytes + io_bytes + tmp_bytes))))

    out_slab = pl.pallas_call(
        kernel,
        out_shape=jax.ShapeDtypeStruct((nblk, c_out, l_out), out_dtype),
        grid_spec=pltpu.PrefetchScalarGridSpec(
            num_scalar_prefetch=0,
            grid=(nblk,),
            in_specs=in_specs,
            out_specs=pl.BlockSpec((1, c_out, l_out), lambda g: (g, 0, 0)),
        ),
        compiler_params=pltpu.CompilerParams(
            dimension_semantics=("parallel",),
            vmem_limit_bytes=vmem_limit),
    )(*inputs)

    # layout plumbing back to (B, C_out, T)
    out = (out_slab.reshape(nblk, c_out, bblk, tp)[:, :, :, :t_len]
                   .transpose(0, 2, 1, 3)
                   .reshape(b_pad, c_out, t_len))
    return out[:b]


# ----------------------------------------------------------------------------
# Deterministic parameter init (shapes implied by the nn.Module).
# BatchNorm is inference-mode (running stats folded into scale/shift).
# ----------------------------------------------------------------------------
def init_params(key, c_in, c_out, dilations=DILATIONS, kernel_size=KERNEL_SIZE):
    nb = len(dilations)
    assert c_out % nb == 0
    c_out_b = c_out // nb
    k_eca = get_kernel_size(c_out)
    ks = jax.random.split(key, 11)

    dw_w = 0.3 * jax.random.normal(ks[0], (nb, c_in, kernel_size), jnp.float32)
    dw_b = 0.1 * jax.random.normal(ks[1], (nb, c_in, 1), jnp.float32)
    pw_w = 0.3 * jax.random.normal(ks[2], (nb, c_out_b, c_in), jnp.float32)
    pw_b = 0.1 * jax.random.normal(ks[3], (nb, c_out_b, 1), jnp.float32)

    gamma = 1.0 + 0.1 * jax.random.normal(ks[4], (nb, c_out_b, 1), jnp.float32)
    beta = 0.1 * jax.random.normal(ks[5], (nb, c_out_b, 1), jnp.float32)
    r_mean = 0.1 * jax.random.normal(ks[6], (nb, c_out_b, 1), jnp.float32)
    r_var = jnp.abs(1.0 + 0.1 * jax.random.normal(ks[7], (nb, c_out_b, 1), jnp.float32))
    eps = 1e-5
    bn_scale = gamma / jnp.sqrt(r_var + eps)
    bn_shift = beta - r_mean * bn_scale

    eca_w = 0.5 * jax.random.normal(ks[8], (1, k_eca), jnp.float32)

    p = dict(dw_w=dw_w, dw_b=dw_b, pw_w=pw_w, pw_b=pw_b,
             bn_scale=bn_scale, bn_shift=bn_shift, eca_w=eca_w)
    if c_in != c_out:
        p["res_w"] = 0.3 * jax.random.normal(ks[9], (c_out, c_in), jnp.float32)
        p["res_b"] = 0.1 * jax.random.normal(ks[10], (c_out, 1), jnp.float32)
    else:                              # nn.Identity residual
        p["res_w"] = None
        p["res_b"] = None
    return p


# ----------------------------------------------------------------------------
# Pure-JAX reference (independent path through lax.conv) for correctness check.
# ----------------------------------------------------------------------------
def reference(x, p, dilations=DILATIONS, kernel_size=KERNEL_SIZE):
    b, c_in, t_len = x.shape
    k_eca = p["eca_w"].shape[1]
    branch_outs = []
    for br, d in enumerate(dilations):
        pad = (kernel_size - 1) * d // 2
        w = p["dw_w"][br][:, None, :]
        dw = lax.conv_general_dilated(
            x, w, window_strides=(1,), padding=[(pad, pad)],
            rhs_dilation=(d,), feature_group_count=c_in,
            dimension_numbers=("NCH", "OIH", "NCH"))
        dw = dw + p["dw_b"][br][None]
        y = jnp.einsum("oc,bct->bot", p["pw_w"][br], dw) + p["pw_b"][br][None]
        y = y * p["bn_scale"][br][None] + p["bn_shift"][br][None]
        y = jnp.maximum(y, 0.0)
        branch_outs.append(y)
    y = jnp.concatenate(branch_outs, axis=1)
    m = jnp.mean(y, axis=2, keepdims=True)
    m_t = jnp.transpose(m, (0, 2, 1))
    w_e = p["eca_w"].reshape(1, 1, k_eca)
    pad_e = (k_eca - 1) // 2
    z = lax.conv_general_dilated(
        m_t, w_e, window_strides=(1,), padding=[(pad_e, pad_e)],
        dimension_numbers=("NCH", "OIH", "NCH"))
    gate = jax.nn.sigmoid(jnp.transpose(z, (0, 2, 1)))
    y = y * gate
    if p.get("res_w", None) is not None:
        r = jnp.einsum("oc,bct->bot", p["res_w"], x) + p["res_b"][None]
    else:
        r = x
    return y + r


if __name__ == "__main__":
    key = jax.random.PRNGKey(0)
    kx, kp, kx2, kp2 = jax.random.split(key, 4)

    # case 1: projection residual (C_in != C_out)
    B, C_IN, T, C_OUT = 2, 4, 16, 32
    x = jax.random.normal(kx, (B, C_IN, T), jnp.float32)
    params = init_params(kp, C_IN, C_OUT)
    ref = jax.block_until_ready(reference(x, params))

    out_f32 = jax.block_until_ready(residual_temporal_conv(x, params, mxu_dtype=None))
    np.testing.assert_allclose(np.asarray(out_f32), np.asarray(ref), atol=2e-3, rtol=2e-3)

    out_bf16 = jax.block_until_ready(residual_temporal_conv(x, params))   # default bf16 MXU
    np.testing.assert_allclose(np.asarray(out_bf16), np.asarray(ref), atol=5e-2, rtol=5e-2)

    # case 2: identity residual (C_in == C_out) -> residual matmul + weight DMA skipped
    x2 = jax.random.normal(kx2, (B, C_OUT, T), jnp.float32)
    params2 = init_params(kp2, C_OUT, C_OUT)
    ref2 = jax.block_until_ready(reference(x2, params2))

    out2_f32 = jax.block_until_ready(residual_temporal_conv(x2, params2, mxu_dtype=None))
    np.testing.assert_allclose(np.asarray(out2_f32), np.asarray(ref2), atol=2e-3, rtol=2e-3)

    out2_bf16 = jax.block_until_ready(residual_temporal_conv(x2, params2))
    np.testing.assert_allclose(np.asarray(out2_bf16), np.asarray(ref2), atol=5e-2, rtol=5e-2)

    print("KERNEL_OK")
</pallas_src>

<mosaic_0001>
module attributes {stable_mosaic.version = 11 : i64} {
  func.func @_residual_temporal_conv_kernel(%arg0: i32, %arg1: memref<1x4x144xf32, #tpu.memory_space<vmem>>, %arg2: memref<9x32x4xf32, #tpu.memory_space<vmem>>, %arg3: memref<32x1xf32, #tpu.memory_space<vmem>>, %arg4: memref<32x32xf32, #tpu.memory_space<vmem>>, %arg5: memref<128x4xf32, #tpu.memory_space<vmem>>, %arg6: memref<4x128xf32, #tpu.memory_space<vmem>>, %arg7: memref<32x4xf32, #tpu.memory_space<vmem>>, %arg8: memref<32x1xf32, #tpu.memory_space<vmem>>, %arg9: memref<1x32x128xf32, #tpu.memory_space<vmem>>) attributes {dimension_semantics = [#tpu.dimension_semantics<parallel>], iteration_bounds = array<i64: 1>, scalar_prefetch = 0 : i64, scratch_operands = 0 : i64, tpu.core_type = #tpu.core_type<tc>, window_params = [{transform_indices = @transform_0, window_bounds = array<i64: 1, 4, 144>}, {pipeline_mode = #tpu.pipeline_mode<synchronous>, transform_indices = @transform_1, window_bounds = array<i64: 9, 32, 4>}, {pipeline_mode = #tpu.pipeline_mode<synchronous>, transform_indices = @transform_2, window_bounds = array<i64: 32, 1>}, {pipeline_mode = #tpu.pipeline_mode<synchronous>, transform_indices = @transform_3, window_bounds = array<i64: 32, 32>}, {pipeline_mode = #tpu.pipeline_mode<synchronous>, transform_indices = @transform_4, window_bounds = array<i64: 128, 4>}, {pipeline_mode = #tpu.pipeline_mode<synchronous>, transform_indices = @transform_5, window_bounds = array<i64: 4, 128>}, {pipeline_mode = #tpu.pipeline_mode<synchronous>, transform_indices = @transform_6, window_bounds = array<i64: 32, 4>}, {pipeline_mode = #tpu.pipeline_mode<synchronous>, transform_indices = @transform_7, window_bounds = array<i64: 32, 1>}, {transform_indices = @transform_8, window_bounds = array<i64: 1, 32, 128>}]} {
    %c0 = arith.constant 0 : index
    %c0_0 = arith.constant 0 : index
    %c0_1 = arith.constant 0 : index
    %0 = vector.load %arg1[%c0, %c0_0, %c0_1] : memref<1x4x144xf32, #tpu.memory_space<vmem>>, vector<1x4x144xf32>
    %1 = vector.shape_cast %0 : vector<1x4x144xf32> to vector<4x144xf32>
    %c0_2 = arith.constant 0 : index
    %c0_3 = arith.constant 0 : index
    %c0_4 = arith.constant 0 : index
    %2 = vector.load %arg2[%c0_2, %c0_3, %c0_4] : memref<9x32x4xf32, #tpu.memory_space<vmem>>, vector<1x32x4xf32>
    %3 = vector.shape_cast %2 : vector<1x32x4xf32> to vector<32x4xf32>
    %4 = vector.extract_strided_slice %1 {offsets = [0, 0], sizes = [4, 128], strides = [1, 1]} : vector<4x144xf32> to vector<4x128xf32>
    %cst = arith.constant dense<0.000000e+00> : vector<32x128xf32>
    %5 = tpu.matmul %3, %4, %cst {dimension_numbers = #tpu.dot_dimension_numbers<[1], [0], [0], [1], [0, 0, 1, 1], [], []>} : vector<32x4xf32>, vector<4x128xf32>, vector<32x128xf32> -> vector<32x128xf32>
    %c1 = arith.constant 1 : index
    %c0_5 = arith.constant 0 : index
    %c0_6 = arith.constant 0 : index
    %6 = vector.load %arg2[%c1, %c0_5, %c0_6] : memref<9x32x4xf32, #tpu.memory_space<vmem>>, vector<1x32x4xf32>
    %7 = vector.shape_cast %6 : vector<1x32x4xf32> to vector<32x4xf32>
    %8 = vector.extract_strided_slice %1 {offsets = [0, 4], sizes = [4, 128], strides = [1, 1]} : vector<4x144xf32> to vector<4x128xf32>
    %cst_7 = arith.constant dense<0.000000e+00> : vector<32x128xf32>
    %9 = tpu.matmul %7, %8, %cst_7 {dimension_numbers = #tpu.dot_dimension_numbers<[1], [0], [0], [1], [0, 0, 1, 1], [], []>} : vector<32x4xf32>, vector<4x128xf32>, vector<32x128xf32> -> vector<32x128xf32>
    %10 = arith.addf %5, %9 : vector<32x128xf32>
    %c2 = arith.constant 2 : index
    %c0_8 = arith.constant 0 : index
    %c0_9 = arith.constant 0 : index
    %11 = vector.load %arg2[%c2, %c0_8, %c0_9] : memref<9x32x4xf32, #tpu.memory_space<vmem>>, vector<1x32x4xf32>
    %12 = vector.shape_cast %11 : vector<1x32x4xf32> to vector<32x4xf32>
    %13 = vector.extract_strided_slice %1 {offsets = [0, 6], sizes = [4, 128], strides = [1, 1]} : vector<4x144xf32> to vector<4x128xf32>
    %cst_10 = arith.constant dense<0.000000e+00> : vector<32x128xf32>
    %14 = tpu.matmul %12, %13, %cst_10 {dimension_numbers = #tpu.dot_dimension_numbers<[1], [0], [0], [1], [0, 0, 1, 1], [], []>} : vector<32x4xf32>, vector<4x128xf32>, vector<32x128xf32> -> vector<32x128xf32>
    %15 = arith.addf %10, %14 : vector<32x128xf32>
    %c3 = arith.constant 3 : index
    %c0_11 = arith.constant 0 : index
    %c0_12 = arith.constant 0 : index
    %16 = vector.load %arg2[%c3, %c0_11, %c0_12] : memref<9x32x4xf32, #tpu.memory_space<vmem>>, vector<1x32x4xf32>
    %17 = vector.shape_cast %16 : vector<1x32x4xf32> to vector<32x4xf32>
    %18 = vector.extract_strided_slice %1 {offsets = [0, 7], sizes = [4, 128], strides = [1, 1]} : vector<4x144xf32> to vector<4x128xf32>
    %cst_13 = arith.constant dense<0.000000e+00> : vector<32x128xf32>
    %19 = tpu.matmul %17, %18, %cst_13 {dimension_numbers = #tpu.dot_dimension_numbers<[1], [0], [0], [1], [0, 0, 1, 1], [], []>} : vector<32x4xf32>, vector<4x128xf32>, vector<32x128xf32> -> vector<32x128xf32>
    %20 = arith.addf %15, %19 : vector<32x128xf32>
    %c4 = arith.constant 4 : index
    %c0_14 = arith.constant 0 : index
    %c0_15 = arith.constant 0 : index
    %21 = vector.load %arg2[%c4, %c0_14, %c0_15] : memref<9x32x4xf32, #tpu.memory_space<vmem>>, vector<1x32x4xf32>
    %22 = vector.shape_cast %21 : vector<1x32x4xf32> to vector<32x4xf32>
    %23 = vector.extract_strided_slice %1 {offsets = [0, 8], sizes = [4, 128], strides = [1, 1]} : vector<4x144xf32> to vector<4x128xf32>
    %cst_16 = arith.constant dense<0.000000e+00> : vector<32x128xf32>
    %24 = tpu.matmul %22, %23, %cst_16 {dimension_numbers = #tpu.dot_dimension_numbers<[1], [0], [0], [1], [0, 0, 1, 1], [], []>} : vector<32x4xf32>, vector<4x128xf32>, vector<32x128xf32> -> vector<32x128xf32>
    %25 = arith.addf %20, %24 : vector<32x128xf32>
    %c5 = arith.constant 5 : index
    %c0_17 = arith.constant 0 : index
    %c0_18 = arith.constant 0 : index
    %26 = vector.load %arg2[%c5, %c0_17, %c0_18] : memref<9x32x4xf32, #tpu.memory_space<vmem>>, vector<1x32x4xf32>
    %27 = vector.shape_cast %26 : vector<1x32x4xf32> to vector<32x4xf32>
    %28 = vector.extract_strided_slice %1 {offsets = [0, 9], sizes = [4, 128], strides = [1, 1]} : vector<4x144xf32> to vector<4x128xf32>
    %cst_19 = arith.constant dense<0.000000e+00> : vector<32x128xf32>
    %29 = tpu.matmul %27, %28, %cst_19 {dimension_numbers = #tpu.dot_dimension_numbers<[1], [0], [0], [1], [0, 0, 1, 1], [], []>} : vector<32x4xf32>, vector<4x128xf32>, vector<32x128xf32> -> vector<32x128xf32>
    %30 = arith.addf %25, %29 : vector<32x128xf32>
    %c6 = arith.constant 6 : index
    %c0_20 = arith.constant 0 : index
    %c0_21 = arith.constant 0 : index
    %31 = vector.load %arg2[%c6, %c0_20, %c0_21] : memref<9x32x4xf32, #tpu.memory_space<vmem>>, vector<1x32x4xf32>
    %32 = vector.shape_cast %31 : vector<1x32x4xf32> to vector<32x4xf32>
    %33 = vector.extract_strided_slice %1 {offsets = [0, 10], sizes = [4, 128], strides = [1, 1]} : vector<4x144xf32> to vector<4x128xf32>
    %cst_22 = arith.constant dense<0.000000e+00> : vector<32x128xf32>
    %34 = tpu.matmul %32, %33, %cst_22 {dimension_numbers = #tpu.dot_dimension_numbers<[1], [0], [0], [1], [0, 0, 1, 1], [], []>} : vector<32x4xf32>, vector<4x128xf32>, vector<32x128xf32> -> vector<32x128xf32>
    %35 = arith.addf %30, %34 : vector<32x128xf32>
    %c7 = arith.constant 7 : index
    %c0_23 = arith.constant 0 : index
    %c0_24 = arith.constant 0 : index
    %36 = vector.load %arg2[%c7, %c0_23, %c0_24] : memref<9x32x4xf32, #tpu.memory_space<vmem>>, vector<1x32x4xf32>
    %37 = vector.shape_cast %36 : vector<1x32x4xf32> to vector<32x4xf32>
    %38 = vector.extract_strided_slice %1 {offsets = [0, 12], sizes = [4, 128], strides = [1, 1]} : vector<4x144xf32> to vector<4x128xf32>
    %cst_25 = arith.constant dense<0.000000e+00> : vector<32x128xf32>
    %39 = tpu.matmul %37, %38, %cst_25 {dimension_numbers = #tpu.dot_dimension_numbers<[1], [0], [0], [1], [0, 0, 1, 1], [], []>} : vector<32x4xf32>, vector<4x128xf32>, vector<32x128xf32> -> vector<32x128xf32>
    %40 = arith.addf %35, %39 : vector<32x128xf32>
    %c8 = arith.constant 8 : index
    %c0_26 = arith.constant 0 : index
    %c0_27 = arith.constant 0 : index
    %41 = vector.load %arg2[%c8, %c0_26, %c0_27] : memref<9x32x4xf32, #tpu.memory_space<vmem>>, vector<1x32x4xf32>
    %42 = vector.shape_cast %41 : vector<1x32x4xf32> to vector<32x4xf32>
    %43 = vector.extract_strided_slice %1 {offsets = [0, 16], sizes = [4, 128], strides = [1, 1]} : vector<4x144xf32> to vector<4x128xf32>
    %cst_28 = arith.constant dense<0.000000e+00> : vector<32x128xf32>
    %44 = tpu.matmul %42, %43, %cst_28 {dimension_numbers = #tpu.dot_dimension_numbers<[1], [0], [0], [1], [0, 0, 1, 1], [], []>} : vector<32x4xf32>, vector<4x128xf32>, vector<32x128xf32> -> vector<32x128xf32>
    %45 = arith.addf %40, %44 : vector<32x128xf32>
    %c0_29 = arith.constant 0 : index
    %c0_30 = arith.constant 0 : index
    %46 = vector.load %arg3[%c0_29, %c0_30] : memref<32x1xf32, #tpu.memory_space<vmem>>, vector<32x1xf32>
    %47 = vector.broadcast %46 : vector<32x1xf32> to vector<32x128xf32>
    %48 = arith.addf %45, %47 : vector<32x128xf32>
    %cst_31 = arith.constant 0.000000e+00 : f32
    %49 = vector.broadcast %cst_31 : f32 to vector<32x128xf32>
    %50 = arith.maximumf %48, %49 : vector<32x128xf32>
    %c0_32 = arith.constant 0 : index
    %c0_33 = arith.constant 0 : index
    %51 = vector.load %arg5[%c0_32, %c0_33] : memref<128x4xf32, #tpu.memory_space<vmem>>, vector<128x4xf32>
    %cst_34 = arith.constant dense<0.000000e+00> : vector<32x4xf32>
    %52 = tpu.matmul %50, %51, %cst_34 {dimension_numbers = #tpu.dot_dimension_numbers<[1], [0], [0], [1], [0, 0, 1, 1], [], []>} : vector<32x128xf32>, vector<128x4xf32>, vector<32x4xf32> -> vector<32x4xf32>
    %c0_35 = arith.constant 0 : index
    %c0_36 = arith.constant 0 : index
    %53 = vector.load %arg4[%c0_35, %c0_36] : memref<32x32xf32, #tpu.memory_space<vmem>>, vector<32x32xf32>
    %cst_37 = arith.constant dense<0.000000e+00> : vector<32x4xf32>
    %54 = tpu.matmul %53, %52, %cst_37 {dimension_numbers = #tpu.dot_dimension_numbers<[1], [0], [0], [1], [0, 0, 1, 1], [], []>} : vector<32x32xf32>, vector<32x4xf32>, vector<32x4xf32> -> vector<32x4xf32>
    %55 = arith.negf %54 : vector<32x4xf32>
    %56 = math.exp %55 : vector<32x4xf32>
    %cst_38 = arith.constant 1.000000e+00 : f32
    %57 = vector.broadcast %cst_38 : f32 to vector<32x4xf32>
    %58 = arith.addf %57, %56 : vector<32x4xf32>
    %59 = arith.divf %57, %58 : vector<32x4xf32>
    %c0_39 = arith.constant 0 : index
    %c0_40 = arith.constant 0 : index
    %60 = vector.load %arg6[%c0_39, %c0_40] : memref<4x128xf32, #tpu.memory_space<vmem>>, vector<4x128xf32>
    %cst_41 = arith.constant dense<0.000000e+00> : vector<32x128xf32>
    %61 = tpu.matmul %59, %60, %cst_41 {dimension_numbers = #tpu.dot_dimension_numbers<[1], [0], [0], [1], [0, 0, 1, 1], [], []>} : vector<32x4xf32>, vector<4x128xf32>, vector<32x128xf32> -> vector<32x128xf32>
    %c0_42 = arith.constant 0 : index
    %c0_43 = arith.constant 0 : index
    %62 = vector.load %arg7[%c0_42, %c0_43] : memref<32x4xf32, #tpu.memory_space<vmem>>, vector<32x4xf32>
    %63 = vector.extract_strided_slice %1 {offsets = [0, 8], sizes = [4, 128], strides = [1, 1]} : vector<4x144xf32> to vector<4x128xf32>
    %cst_44 = arith.constant dense<0.000000e+00> : vector<32x128xf32>
    %64 = tpu.matmul %62, %63, %cst_44 {dimension_numbers = #tpu.dot_dimension_numbers<[1], [0], [0], [1], [0, 0, 1, 1], [], []>} : vector<32x4xf32>, vector<4x128xf32>, vector<32x128xf32> -> vector<32x128xf32>
    %c0_45 = arith.constant 0 : index
    %c0_46 = arith.constant 0 : index
    %65 = vector.load %arg8[%c0_45, %c0_46] : memref<32x1xf32, #tpu.memory_space<vmem>>, vector<32x1xf32>
    %66 = vector.broadcast %65 : vector<32x1xf32> to vector<32x128xf32>
    %67 = arith.addf %64, %66 : vector<32x128xf32>
    %68 = arith.mulf %50, %61 : vector<32x128xf32>
    %69 = arith.addf %68, %67 : vector<32x128xf32>
    %c0_47 = arith.constant 0 : index
    %c0_48 = arith.constant 0 : index
    %c0_49 = arith.constant 0 : index
    %70 = vector.load %arg9[%c0_47, %c0_48, %c0_49] : memref<1x32x128xf32, #tpu.memory_space<vmem>>, vector<1x32x128xf32>
    %71 = vector.shape_cast %70 : vector<1x32x128xf32> to vector<32x128xf32>
    %72 = vector.shape_cast %69 : vector<32x128xf32> to vector<1x32x128xf32>
    tpu.vector_store %arg9[%c0_47, %c0_48, %c0_49], %72 {strides = array<i32>} : memref<1x32x128xf32, #tpu.memory_space<vmem>>, vector<1x32x128xf32>,
    return
  }
  func.func @transform_0(%arg0: i32) -> (i32, i32, i32) {
    %c0_i32 = arith.constant 0 : i32
    %c0_i32_0 = arith.constant 0 : i32
    %c0_i32_1 = arith.constant 0 : i32
    return %arg0, %c0_i32, %c0_i32_0 : i32, i32, i32
  }
  func.func @transform_1(%arg0: i32) -> (i32, i32, i32) {
    %c0_i32 = arith.constant 0 : i32
    %c0_i32_0 = arith.constant 0 : i32
    %c0_i32_1 = arith.constant 0 : i32
    %c0_i32_2 = arith.constant 0 : i32
    return %c0_i32, %c0_i32_0, %c0_i32_1 : i32, i32, i32
  }
  func.func @transform_2(%arg0: i32) -> (i32, i32) {
    %c0_i32 = arith.constant 0 : i32
    %c0_i32_0 = arith.constant 0 : i32
    %c0_i32_1 = arith.constant 0 : i32
    return %c0_i32, %c0_i32_0 : i32, i32
  }
  func.func @transform_3(%arg0: i32) -> (i32, i32) {
    %c0_i32 = arith.constant 0 : i32
    %c0_i32_0 = arith.constant 0 : i32
    %c0_i32_1 = arith.constant 0 : i32
    return %c0_i32, %c0_i32_0 : i32, i32
  }
  func.func @transform_4(%arg0: i32) -> (i32, i32) {
    %c0_i32 = arith.constant 0 : i32
    %c0_i32_0 = arith.constant 0 : i32
    %c0_i32_1 = arith.constant 0 : i32
    return %c0_i32, %c0_i32_0 : i32, i32
  }
  func.func @transform_5(%arg0: i32) -> (i32, i32) {
    %c0_i32 = arith.constant 0 : i32
    %c0_i32_0 = arith.constant 0 : i32
    %c0_i32_1 = arith.constant 0 : i32
    return %c0_i32, %c0_i32_0 : i32, i32
  }
  func.func @transform_6(%arg0: i32) -> (i32, i32) {
    %c0_i32 = arith.constant 0 : i32
    %c0_i32_0 = arith.constant 0 : i32
    %c0_i32_1 = arith.constant 0 : i32
    return %c0_i32, %c0_i32_0 : i32, i32
  }
  func.func @transform_7(%arg0: i32) -> (i32, i32) {
    %c0_i32 = arith.constant 0 : i32
    %c0_i32_0 = arith.constant 0 : i32
    %c0_i32_1 = arith.constant 0 : i32
    return %c0_i32, %c0_i32_0 : i32, i32
  }
  func.func @transform_8(%arg0: i32) -> (i32, i32, i32) {
    %c0_i32 = arith.constant 0 : i32
    %c0_i32_0 = arith.constant 0 : i32
    %c0_i32_1 = arith.constant 0 : i32
    return %arg0, %c0_i32, %c0_i32_0 : i32, i32, i32
  }
}

</mosaic_0001>

<bundles_post_ra>
// kernel: tpu_custom_call.1
= control target key start
LH: loop header
LB: loop body
LE: loop exit
PB: predicated region body
PF: predicated region fallthrough
CT: control target
= control target key end

     0   :  { %vm61_vm0 = vcmask 1043456   ;;  %vm48_vm1 = vcmask 31744   ;;  %s2004_s9 = smov 122   ;;  %s2005_s10 = smov 121   ;;  %s2387_s0 = inlined_call_operand.vmem [shape: f32[1,4,144], index: 0, kind: input, shape index: {}]   ;;  %s2388_s1 = inlined_call_operand.vmem [shape: f32[9,32,4], index: 1, kind: input, shape index: {}]   ;;  %s2389_s2 = inlined_call_operand.vmem [shape: f32[32,1], index: 2, kind: input, shape index: {}]   ;;  %s2390_s3 = inlined_call_operand.vmem [shape: f32[32,32], index: 3, kind: input, shape index: {}]   ;;  %s2391_s4 = inlined_call_operand.vmem [shape: f32[128,4], index: 4, kind: input, shape index: {}]   ;;  %s2392_s5 = inlined_call_operand.vmem [shape: f32[4,128], index: 5, kind: input, shape index: {}]   ;;  %s2393_s6 = inlined_call_operand.vmem [shape: f32[32,4], index: 6, kind: input, shape index: {}]   ;;  %s2394_s7 = inlined_call_operand.vmem [shape: f32[32,1], index: 7, kind: input, shape index: {}]   ;;  %s2395_s8 = inlined_call_operand.hbm [shape: f32[1,32,128], index: 8, kind: output, shape index: {}]  }
   0x1   :  { %v30_v0 = vld [vmem:[%s2387_s0] sm:$0xff]  ;;  %v32_v3 = vld [vmem:[%s2388_s1 + $0x8] sm:$0xff]  ;;  %v33_v4 = vld [vmem:[%s2388_s1 + $0x10] sm:$0xff] }
   0x2   :  { %v31_v1 = vld [vmem:[%s2388_s1] sm:$0xff]  ;;  %253 = vrot.lane.b32.xlu0 %v30_v0, %s2004_s9  ;;  %367 = vrot.lane.b32.xlu1 %v30_v0, %s2005_s10  ;;  %v41_v2 = vcombine.high %v30_v0, %v30_v0  ;;  %v34_v5 = vld [vmem:[%s2388_s1 + $0x18] sm:$0xff] }
   0x3   :  { %1745 = vmatprep.subr.msk.mxu0 %vm61_vm0, %v30_v0  ;;  %1747 = vmatprep.mubr.msk.f32.mxu0 %vm48_vm1, %v31_v1 }
   0x4   :  { %1746 = vmatpush3.msk.msra.mxu0 %vm61_vm0, %v30_v0 }
   0x5   :  { %1748 = vmatmul.mubr.msk.f32.vlgmr.msra.gmra.mrb[0].mxu0 %vm48_vm1, %v32_v3 }
   0x6   :  { %255 = vrot.lane.b32.xlu0 %v41_v2, %s2004_s9  ;;  %369 = vrot.lane.b32.xlu1 %v41_v2, %s2005_s10 }
   0x7   :  { %13 = vsyncpa [#allocation3], 0  ;;  %1750 = vmatprep.mubr.msk.f32.mxu0 %vm48_vm1, %v33_v4  ;;  %v1573_v6 = vld [vmem:[%s2388_s1 + $0x40] sm:$0xff]  ;;  %s2006_s18 = smov 120   ;;  %s2007_s19 = smov 119   ;;  %v1047_v8 = vld [vmem:[%s2389_s2 + $0x8] sm:$0xff] }
   0x8   :  { %s2008_s20 = smov 118   ;;  %s2009_s21 = smov 116   ;;  %v1559_v7 = vld [vmem:[%s2388_s1 + $0x20] sm:$0xff]  ;;  %v2012_v10 = vmov 0   ;;  %v1048_v11 = vld [vmem:[%s2389_s2 + $0x10] sm:$0xff]  ;;  %v1049_v12 = vld [vmem:[%s2389_s2 + $0x18] sm:$0xff] }
   0x9   :  { %1751 = vmatmul.mubr.msk.f32.gmra.mrb[2].mxu0 %vm48_vm1, %v34_v5  ;;  %s2010_s22 = smov 124   ;;  %s2011_s23 = smov 112   ;;  %1739 = vmatprep.mubr.msk.f32.mxu1 %vm48_vm1, %v1559_v7  ;;  %v1046_v9 = vld [vmem:[%s2389_s2] sm:$0xff]  ;;  %v1411_v14 = vld [vmem:[%s2394_s7 + $0x8] sm:$0xff]  ;;  %v1412_v15 = vld [vmem:[%s2394_s7 + $0x10] sm:$0xff]  ;;  %vm257_vm2 = vcmask 998400  }
   0xa   :  { %483 = vrot.lane.b32.xlu1 %v41_v2, %s2006_s18  ;;  %481 = vrot.lane.b32.xlu0 %v30_v0, %s2006_s18  ;;  %v1410_v13 = vld [vmem:[%s2394_s7] sm:$0xff]  ;;  %v1413_v16 = vld [vmem:[%s2394_s7 + $0x18] sm:$0xff]  ;;  %vm371_vm3 = vcmask 990208   ;;  %vm485_vm4 = vcmask 982016   ;;  %vm599_vm5 = vcmask 973824   ;;  %vm713_vm6 = vcmask 965632  }
   0xb   :  { %1755 = vmatprep.mubr.msk.f32.mxu0 %vm48_vm1, %v1573_v6  ;;  %1962 = vset.pattern.permute.xlu1 %v2012_v10  ;;  %v1574_v23 = vld [vmem:[%s2388_s1 + $0x48] sm:$0xff]  ;;  %v1575_v24 = vld [vmem:[%s2388_s1 + $0x50] sm:$0xff]  ;;  %v1576_v27 = vld [vmem:[%s2388_s1 + $0x58] sm:$0xff]  ;;  %vm46_vm7 = vcmask 1014784   ;;  %vm827_vm8 = vcmask 949248   ;;  %vm941_vm9 = vcmask 916480  }
   0xc   :  { %1961 = vset.pattern.permute.xlu0 %v2012_v10  ;;  %v1582_v29 = vld [vmem:[%s2388_s1 + $0x60] sm:$0xff]  ;;  %v1583_v32 = vld [vmem:[%s2388_s1 + $0x68] sm:$0xff]  ;;  %v1584_v33 = vld [vmem:[%s2388_s1 + $0x70] sm:$0xff]  ;;  %vm1183_vm10 = vcmask 261120  }
   0xd   :  { %v1585_v37 = vld [vmem:[%s2388_s1 + $0x78] sm:$0xff]  ;;  %v1591_v38 = vld [vmem:[%s2388_s1 + $0x80] sm:$0xff]  ;;  %v1592_v41 = vld [vmem:[%s2388_s1 + $0x88] sm:$0xff] }
   0xe   :  { %597 = vrot.lane.b32.xlu1 %v41_v2, %s2007_s19  ;;  %595 = vrot.lane.b32.xlu0 %v30_v0, %s2007_s19  ;;  %v1593_v42 = vld [vmem:[%s2388_s1 + $0x90] sm:$0xff]  ;;  %v1078_v44 = vld [vmem:[%s2391_s4] sm:$0xff] }
   0xf   :  { %v1079_v45 = vld [vmem:[%s2391_s4 + $0x8] sm:$0xff]  ;;  %v1594_v48 = vld [vmem:[%s2388_s1 + $0x98] sm:$0xff]  ;;  %v1600_v51 = vld [vmem:[%s2388_s1 + $0xa0] sm:$0xff] }
  0x10   :  { %v1560_v50 = vld [vmem:[%s2388_s1 + $0x28] sm:$0xff]  ;;  %v1561_v52 = vld [vmem:[%s2388_s1 + $0x30] sm:$0xff]  ;;  %v1877_v53 = vpack.c.bf16 %v1079_v45, %v1078_v44  ;;  %v1081_v55 = vld [vmem:[%s2391_s4 + $0x18] sm:$0xff] }
  0x11   :  { %v1080_v54 = vld [vmem:[%s2391_s4 + $0x10] sm:$0xff]  ;;  %v1601_v56 = vld [vmem:[%s2388_s1 + $0xa8] sm:$0xff]  ;;  %v1562_v57 = vld [vmem:[%s2388_s1 + $0x38] sm:$0xff] }
  0x12   :  { %711 = vrot.lane.b32.xlu1 %v41_v2, %s2008_s20  ;;  %709 = vrot.lane.b32.xlu0 %v30_v0, %s2008_s20  ;;  %v1082_v58 = vld [vmem:[%s2391_s4 + $0x20] sm:$0xff]  ;;  %v1083_v59 = vld [vmem:[%s2391_s4 + $0x28] sm:$0xff]  ;;  %v1881_v61 = vpack.c.bf16 %v1081_v55, %v1080_v54 }
  0x13   :  { %v1602_v60 = vld [vmem:[%s2388_s1 + $0xb0] sm:$0xff]  ;;  %v1885_v63 = vpack.c.bf16 %v1083_v59, %v1082_v58  ;;  %v1609_v3 = vld [vmem:[%s2388_s1 + $0xc0] sm:$0xff]  ;;  %v1610_v7 = vld [vmem:[%s2388_s1 + $0xc8] sm:$0xff] }
  0x14   :  { %v1084_v1 = vld [vmem:[%s2391_s4 + $0x30] sm:$0xff] }
  0x15   :  { %v1611_v10 = vld [vmem:[%s2388_s1 + $0xd0] sm:$0xff] }
  0x16   :  { %825 = vrot.lane.b32.xlu1 %v41_v2, %s2009_s21  ;;  %823 = vrot.lane.b32.xlu0 %v30_v0, %s2009_s21 }
  0x1a   :  { %44 = vrot.lane.b32.xlu1 %v41_v2, %s2010_s22  ;;  %42 = vrot.lane.b32.xlu0 %v30_v0, %s2010_s22 }
  0x1e   :  { %939 = vrot.lane.b32.xlu1 %v41_v2, %s2011_s23  ;;  %937 = vrot.lane.b32.xlu0 %v30_v0, %s2011_s23  ;;  %v1603_v0 = vld [vmem:[%s2388_s1 + $0xb8] sm:$0xff] }
  0x1f   :  { %v1085_v2 = vld [vmem:[%s2391_s4 + $0x38] sm:$0xff] }
  0x20   :  { %v1889_v6 = vpack.c.bf16 %v1085_v2, %v1084_v1  ;;  %v1181_v1 = vld [vmem:[%s2390_s3 + $0x10] sm:$0xff]  ;;  %v1182_v2 = vld [vmem:[%s2390_s3 + $0x18] sm:$0xff] }
  0x22   :  { %1057 = vperm.xlu1 %1962, %v1047_v8   ;;  %1052 = vperm.xlu0 %1961, %v1046_v9   ;;  %v1086_v8 = vld [vmem:[%s2391_s4 + $0x40] sm:$0xff]  ;;  %v1087_v9 = vld [vmem:[%s2391_s4 + $0x48] sm:$0xff] }
  0x26   :  { %1062 = vperm.xlu1 %1962, %v1048_v11   ;;  %1067 = vperm.xlu0 %1961, %v1049_v12   ;;  %v1893_v12 = vpack.c.bf16 %v1087_v9, %v1086_v8 }
  0x2a   :  { %1416 = vperm.xlu1 %1962, %v1410_v13   ;;  %1421 = vperm.xlu0 %1961, %v1411_v14   ;;  %v1612_v13 = vld [vmem:[%s2388_s1 + $0xd8] sm:$0xff]  ;;  %v1088_v14 = vld [vmem:[%s2391_s4 + $0x50] sm:$0xff] }
  0x2e   :  { %1426 = vperm.xlu1 %1962, %v1412_v15   ;;  %1431 = vperm.xlu0 %1961, %v1413_v16   ;;  %v1089_v15 = vld [vmem:[%s2391_s4 + $0x58] sm:$0xff]  ;;  %v1618_v16 = vld [vmem:[%s2388_s1 + $0xe0] sm:$0xff] }
  0x74   :  { %v254_v17 = vpop.permute.xlu0 %253  ;;  %v368_v18 = vpop.permute.xlu1 %367 }
  0x78   :  { %v256_v19 = vpop.permute.xlu0 %255  ;;  %v370_v20 = vpop.permute.xlu1 %369 }
  0x79   :  { %v258_v21 = vsel %vm257_vm2, %v254_v17, %v256_v19  ;;  %v372_v22 = vsel %vm371_vm3, %v368_v18, %v370_v20  ;;  %v1897_v17 = vpack.c.bf16 %v1089_v15, %v1088_v14  ;;  %v1619_v18 = vld [vmem:[%s2388_s1 + $0xe8] sm:$0xff]  ;;  %v1620_v19 = vld [vmem:[%s2388_s1 + $0xf0] sm:$0xff]  ;;  %v1621_v20 = vld [vmem:[%s2388_s1 + $0xf8] sm:$0xff] }
  0x7a   :  { %1753 = vmatprep.subr.msk.mxu0 %vm61_vm0, %v258_v21 }
  0x7b   :  { %1754 = vmatpush3.msk.msra.mxu0 %vm61_vm0, %v258_v21  ;;  %v1627_v21 = vld [vmem:[%s2388_s1 + $0x100] sm:$0xff] }
  0x7c   :  { %1756 = vmatmul.mubr.msk.f32.vlgmr.msra.gmra.mrb[0].mxu0 %vm48_vm1, %v1574_v23  ;;  %1761 = vmatprep.subr.msk.mxu0 %vm61_vm0, %v372_v22  ;;  %v484_v25 = vpop.permute.xlu1 %483  ;;  %v482_v26 = vpop.permute.xlu0 %481  ;;  %v1629_v23 = vld [vmem:[%s2388_s1 + $0x110] sm:$0xff] }
  0x7d   :  { %1762 = vmatpush3.msk.msra.mxu0 %vm61_vm0, %v372_v22  ;;  %1758 = vmatprep.mubr.msk.f32.mxu0 %vm48_vm1, %v1575_v24  ;;  %v2129_v28 = vsel %vm485_vm4, %v482_v26, %v484_v25  ;;  %v1628_v22 = vld [vmem:[%s2388_s1 + $0x108] sm:$0xff]  ;;  %v1630_v24 = vld [vmem:[%s2388_s1 + $0x118] sm:$0xff]  ;;  %v1090_v25 = vld [vmem:[%s2391_s4 + $0x60] sm:$0xff] }
  0x7e   :  { %1769 = vmatprep.subr.msk.mxu0 %vm61_vm0, %v2129_v28  ;;  %v1091_v26 = vld [vmem:[%s2391_s4 + $0x68] sm:$0xff] }
  0x80   :  { %1759 = vmatmul.mubr.msk.f32.gmra.mrb[2].mxu0 %vm48_vm1, %v1576_v27  ;;  %v598_v30 = vpop.permute.xlu1 %597  ;;  %v596_v31 = vpop.permute.xlu0 %595  ;;  %v1901_v27 = vpack.c.bf16 %v1091_v26, %v1090_v25  ;;  %v1409_v25 = vld [vmem:[%s2393_s6 + $0x18] sm:$0xff] }
  0x81   :  { %1763 = vmatprep.mubr.msk.f32.mxu0 %vm48_vm1, %v1582_v29  ;;  %v600_v34 = vsel %vm599_vm5, %v596_v31, %v598_v30  ;;  %v1092_v29 = vld [vmem:[%s2391_s4 + $0x70] sm:$0xff]  ;;  %v1093_v30 = vld [vmem:[%s2391_s4 + $0x78] sm:$0xff] }
  0x82   :  { %v1905_v31 = vpack.c.bf16 %v1093_v30, %v1092_v29 }
  0x84   :  { %1764 = vmatmul.mubr.msk.f32.vlgmr.msra.gmra.mrb[0].mxu0 %vm48_vm1, %v1583_v32  ;;  %v712_v35 = vpop.permute.xlu1 %711  ;;  %v710_v36 = vpop.permute.xlu0 %709 }
  0x85   :  { %1766 = vmatprep.mubr.msk.f32.mxu0 %vm48_vm1, %v1584_v33  ;;  %1770 = vmatpush3.msk.msra.mxu0 %vm61_vm0, %v2129_v28  ;;  %v714_v43 = vsel %vm713_vm6, %v710_v36, %v712_v35 }
  0x86   :  { %1777 = vmatprep.subr.msk.mxu0 %vm61_vm0, %v600_v34 }
  0x88   :  { %1767 = vmatmul.mubr.msk.f32.gmra.mrb[2].mxu0 %vm48_vm1, %v1585_v37  ;;  %v826_v39 = vpop.permute.xlu1 %825  ;;  %v824_v40 = vpop.permute.xlu0 %823 }
  0x89   :  { %1771 = vmatprep.mubr.msk.f32.mxu0 %vm48_vm1, %v1591_v38  ;;  %v828_v62 = vsel %vm827_vm8, %v824_v40, %v826_v39 }
  0x8c   :  { %1772 = vmatmul.mubr.msk.f32.vlgmr.msra.gmra.mrb[0].mxu0 %vm48_vm1, %v1592_v41  ;;  %v45_v46 = vpop.permute.xlu1 %44  ;;  %v43_v47 = vpop.permute.xlu0 %42 }
  0x8d   :  { %1774 = vmatprep.mubr.msk.f32.mxu0 %vm48_vm1, %v1593_v42  ;;  %1778 = vmatpush3.msk.msra.mxu0 %vm61_vm0, %v600_v34  ;;  %v47_v49 = vsel %vm46_vm7, %v43_v47, %v45_v46 }
  0x8e   :  { %1785 = vmatprep.subr.msk.mxu0 %vm61_vm0, %v714_v43  ;;  %1737 = vmatprep.subr.msk.mxu1 %vm61_vm0, %v47_v49 }
  0x8f   :  { %1738 = vmatpush3.msk.msra.mxu1 %vm61_vm0, %v47_v49 }
  0x90   :  { %1775 = vmatmul.mubr.msk.f32.gmra.mrb[2].mxu0 %vm48_vm1, %v1594_v48  ;;  %1740 = vmatmul.mubr.msk.f32.vlgmr.msra.gmra.mrb[0].mxu1 %vm48_vm1, %v1560_v50  ;;  %v940_v4 = vpop.permute.xlu1 %939  ;;  %v938_v5 = vpop.permute.xlu0 %937 }
  0x91   :  { %1779 = vmatprep.mubr.msk.f32.mxu0 %vm48_vm1, %v1600_v51  ;;  %1742 = vmatprep.mubr.msk.f32.mxu1 %vm48_vm1, %v1561_v52  ;;  %v942_v11 = vsel %vm941_vm9, %v938_v5, %v940_v4 }
  0x92   :  { %1878 = vmatprep.subr.bf16.mxu1 %v1877_v53 }
  0x93   :  { %1880 = vmatpush3.bf16.msra.mxu1 %v1877_v53 }
  0x94   :  { %1780 = vmatmul.mubr.msk.f32.vlgmr.msra.gmra.mrb[0].mxu0 %vm48_vm1, %v1601_v56  ;;  %1743 = vmatmul.mubr.msk.f32.gmra.mrb[2].mxu1 %vm48_vm1, %v1562_v57  ;;  %v1179_v56 = vld [vmem:[%s2390_s3] sm:$0xff] }
  0x95   :  { %1782 = vmatprep.mubr.msk.f32.mxu0 %vm48_vm1, %v1602_v60  ;;  %1786 = vmatpush3.msk.msra.mxu0 %vm61_vm0, %v714_v43 }
  0x96   :  { %1793 = vmatprep.subr.msk.mxu0 %vm61_vm0, %v828_v62  ;;  %1882 = vmatprep.subr.bf16.mxu1 %v1881_v61 }
  0x97   :  { %1884 = vmatpush3.bf16.msra.mxu1 %v1881_v61 }
  0x98   :  { %1783 = vmatmul.mubr.msk.f32.gmra.mrb[2].mxu0 %vm48_vm1, %v1603_v0  ;;  %1886 = vmatprep.subr.bf16.mxu1 %v1885_v63  ;;  %v1180_v0 = vld [vmem:[%s2390_s3 + $0x8] sm:$0xff] }
  0x99   :  { %1787 = vmatprep.mubr.msk.f32.mxu0 %vm48_vm1, %v1609_v3 }
  0x9b   :  { %1888 = vmatpush3.bf16.msra.mxu1 %v1885_v63  ;;  %v1305_v63 = vld [vmem:[%s2392_s5] sm:$0xf] }
  0x9c   :  { %1788 = vmatmul.mubr.msk.f32.vlgmr.msra.gmra.mrb[0].mxu0 %vm48_vm1, %v1610_v7  ;;  %1890 = vmatprep.subr.bf16.mxu1 %v1889_v6 }
  0x9d   :  { %1790 = vmatprep.mubr.msk.f32.mxu0 %vm48_vm1, %v1611_v10  ;;  %1794 = vmatpush3.msk.msra.mxu0 %vm61_vm0, %v828_v62 }
  0x9e   :  { %1801 = vmatprep.subr.msk.mxu0 %vm61_vm0, %v942_v11 }
  0x9f   :  { %1892 = vmatpush3.bf16.msra.mxu1 %v1889_v6 }
  0xa0   :  { %1791 = vmatmul.mubr.msk.f32.gmra.mrb[2].mxu0 %vm48_vm1, %v1612_v13  ;;  %1894 = vmatprep.subr.bf16.mxu1 %v1893_v12 }
  0xa1   :  { %1795 = vmatprep.mubr.msk.f32.mxu0 %vm48_vm1, %v1618_v16  ;;  %v1053_v36 = vpop.permute.xlu0 %1052  ;;  %v1058_v38 = vpop.permute.xlu1 %1057 }
  0xa3   :  { %1896 = vmatpush3.bf16.msra.mxu1 %v1893_v12 }
  0xa4   :  { %1796 = vmatmul.mubr.msk.f32.vlgmr.msra.gmra.mrb[0].mxu0 %vm48_vm1, %v1619_v18  ;;  %1898 = vmatprep.subr.bf16.mxu1 %v1897_v17 }
  0xa5   :  { %1798 = vmatprep.mubr.msk.f32.mxu0 %vm48_vm1, %v1620_v19  ;;  %1802 = vmatpush3.msk.msra.mxu0 %vm61_vm0, %v942_v11  ;;  %v1068_v48 = vpop.permute.xlu0 %1067  ;;  %v1063_v51 = vpop.permute.xlu1 %1062 }
  0xa7   :  { %1900 = vmatpush3.bf16.msra.mxu1 %v1897_v17 }
  0xa8   :  { %1799 = vmatmul.mubr.msk.f32.gmra.mrb[2].mxu0 %vm48_vm1, %v1621_v20  ;;  %1902 = vmatprep.subr.bf16.mxu1 %v1901_v27 }
  0xa9   :  { %1803 = vmatprep.mubr.msk.f32.mxu0 %vm48_vm1, %v1627_v21 }
  0xab   :  { %1904 = vmatpush3.bf16.msra.mxu1 %v1901_v27 }
  0xac   :  { %1804 = vmatmul.mubr.msk.f32.vlgmr.msra.gmra.mrb[0].mxu0 %vm48_vm1, %v1628_v22  ;;  %1906 = vmatprep.subr.bf16.mxu1 %v1905_v31  ;;  %v1406_v22 = vld [vmem:[%s2393_s6] sm:$0xff] }
  0xad   :  { %1806 = vmatprep.mubr.msk.f32.mxu0 %vm48_vm1, %v1629_v23 }
  0xaf   :  { %1908 = vmatpush3.bf16.msra.mxu1 %v1905_v31  ;;  %v1422_v31 = vpop.permute.xlu0 %1421 }
  0xb0   :  { %1807 = vmatmul.mubr.msk.f32.gmra.mrb[2].mxu0 %vm48_vm1, %v1630_v24  ;;  %v1407_v24 = vld [vmem:[%s2393_s6 + $0x8] sm:$0xff] }
 0x163   :  { %v1741_v32 = vpop.f32.mrb[0].mxu1 }
 0x164   :  { %v130_v33 = vpop.f32.mrb[1].mxu1 }
 0x167   :  { %v1744_v34 = vpop.f32.mrb[2].mxu1 }
 0x168   :  { %v140_v35 = vpop.f32.mrb[3].mxu1 }
 0x17f   :  { %v1805_v37 = vpop.f32.mrb[0].mxu0 }
 0x180   :  { %v1917_v39 = vadd.f32 %v1805_v37, %v1741_v32  ;;  %v1023_v40 = vpop.f32.mrb[1].mxu0  ;;  %v1417_v32 = vpop.permute.xlu1 %1416 }
 0x181   :  { %v1918_v41 = vadd.f32 %v1023_v40, %v130_v33  ;;  %v1432_v40 = vpop.permute.xlu0 %1431 }
 0x182   :  { %v2302_v42 = vadd.f32 %v1917_v39, %v1058_v38 }
 0x183   :  { %v2304_v43 = vadd.f32 %v1918_v41, %v1053_v36  ;;  %v1808_v44 = vpop.f32.mrb[2].mxu0 }
 0x184   :  { %v1919_v45 = vadd.f32 %v1808_v44, %v1744_v34  ;;  %v1033_v46 = vpop.f32.mrb[3].mxu0  ;;  %v1075_v50 = vmax.f32 %v2302_v42, 0.0 }
 0x185   :  { %v1074_v47 = vmax.f32 %v2304_v43, 0.0  ;;  %v1920_v49 = vadd.f32 %v1033_v46, %v140_v35 }
 0x186   :  { %v2308_v52 = vadd.f32 %v1919_v45, %v1068_v48  ;;  %v1427_v45 = vpop.permute.xlu1 %1426 }
 0x187   :  { %v2310_v53 = vadd.f32 %v1920_v49, %v1063_v51  ;;  %1841 = vmatprep.mubr.f32.mxu1 %v1074_v47 }
 0x188   :  { %1842 = vmatmul.mubr.f32.vlgmr.msra.gmra.mrb[4].mxu1 %v1075_v50  ;;  %v1077_v55 = vmax.f32 %v2308_v52, 0.0 }
 0x189   :  { %v1076_v54 = vmax.f32 %v2310_v53, 0.0 }
 0x18b   :  { %1844 = vmatprep.mubr.f32.mxu1 %v1076_v54 }
 0x18c   :  { %1845 = vmatmul.mubr.f32.gmra.mrb[6].mxu1 %v1077_v55 }
 0x18d   :  { %1855 = vmatprep.mubr.msk.f32.mxu1 %vm1183_vm10, %v1179_v56 }
 0x25b   :  { %v1843_v57 = vpop.f32.mrb[4].mxu1 }
 0x25c   :  { %v1160_v58 = vpop.f32.mrb[5].mxu1 }
 0x25d   :  { %v1909_v59 = vpack.c.bf16 %v1843_v57, %v1160_v58 }
 0x25f   :  { %v1846_v60 = vpop.f32.mrb[6].mxu1  ;;  %1910 = vmatprep.subr.bf16.mxu1 %v1909_v59 }
 0x260   :  { %v1170_v61 = vpop.f32.mrb[7].mxu1  ;;  %1912 = vmatpush3.bf16.msra.mxu1 %v1909_v59 }
 0x261   :  { %v1913_v62 = vpack.c.bf16 %v1846_v60, %v1170_v61 }
 0x263   :  { %1914 = vmatprep.subr.bf16.mxu1 %v1913_v62 }
 0x264   :  { %1916 = vmatpush3.bf16.msra.mxu1 %v1913_v62 }
 0x265   :  { %1861 = vmatprep.subr.msk.mxu1 %vm61_vm0, %v1305_v63 }
 0x267   :  { %1856 = vmatmul.mubr.msk.f32.vlgmr.msra.gmra.mrb[8].mxu1 %vm1183_vm10, %v1180_v0 }
 0x268   :  { %1862 = vmatpush3.msk.msra.mxu1 %vm61_vm0, %v1305_v63  ;;  %1858 = vmatprep.mubr.msk.f32.mxu1 %vm1183_vm10, %v1181_v1 }
 0x269   :  { %1869 = vmatprep.subr.msk.mxu1 %vm61_vm0, %v2129_v28 }
 0x26b   :  { %1859 = vmatmul.mubr.msk.f32.gmra.mrb[10].mxu1 %vm1183_vm10, %v1182_v2 }
 0x33a   :  { %v1857_v3 = vpop.f32.mrb[8].mxu1 }
 0x33b   :  { %v1641_v4 = vmul.f32 -1.442695, %v1857_v3  ;;  %v1262_v5 = vpop.f32.mrb[9].mxu1 }
 0x33c   :  { %v1640_v6 = vmul.f32 -1.442695, %v1262_v5 }
 0x33d   :  { %1964 = vpow2.f32 %v1641_v4 }
 0x33e   :  { %1966 = vpow2.f32 %v1640_v6  ;;  %v1860_v7 = vpop.f32.mrb[10].mxu1 }
 0x33f   :  { %v1643_v8 = vmul.f32 -1.442695, %v1860_v7  ;;  %v1272_v9 = vpop.f32.mrb[11].mxu1 }
 0x340   :  { %v1642_v10 = vmul.f32 -1.442695, %v1272_v9 }
 0x341   :  { %1968 = vpow2.f32 %v1643_v8 }
 0x342   :  { %1970 = vpow2.f32 %v1642_v10 }
 0x347   :  { %v1965_v11 = vpop.eup %1964 }
 0x348   :  { %v1967_v12 = vpop.eup %1966  ;;  %v1294_v13 = vadd.f32 1.0, %v1965_v11 }
 0x349   :  { %v1293_v14 = vadd.f32 1.0, %v1967_v12 }
 0x34b   :  { %v1969_v15 = vpop.eup %1968  ;;  %1972 = vrcp.f32 %v1293_v14 }
 0x34c   :  { %v1971_v16 = vpop.eup %1970  ;;  %1974 = vrcp.f32 %v1294_v13  ;;  %v1296_v17 = vadd.f32 1.0, %v1969_v15 }
 0x34d   :  { %v1295_v18 = vadd.f32 1.0, %v1971_v16 }
 0x34f   :  { %1976 = vrcp.f32 %v1295_v18 }
 0x350   :  { %1978 = vrcp.f32 %v1296_v17 }
 0x355   :  { %v1973_v19 = vpop.eup %1972 }
 0x356   :  { %v1975_v20 = vpop.eup %1974  ;;  %1863 = vmatprep.mubr.msk.f32.mxu1 %vm48_vm1, %v1973_v19 }
 0x357   :  { %1864 = vmatmul.mubr.msk.f32.vlgmr.msra.gmra.mrb[12].mxu1 %vm48_vm1, %v1975_v20 }
 0x358   :  { %1870 = vmatpush3.msk.msra.mxu1 %vm61_vm0, %v2129_v28  ;;  %v1408_v28 = vld [vmem:[%s2393_s6 + $0x10] sm:$0xff]  ;;  %s2013_s6 = smov [#allocation2]  }
 0x359   :  { %v1977_v21 = vpop.eup %1976  ;;  %s1548_s23 = sshll.u32 %s2013_s6, 4  ;;  %s1549_s23 = int_to_ptr.vmem [resolvable:$true] %s1548_s23 }
 0x35a   :  { %v1979_v23 = vpop.eup %1978  ;;  %1866 = vmatprep.mubr.msk.f32.mxu1 %vm48_vm1, %v1977_v21  ;;  %s1980_s24 = scalar_lea.vmem %s1549_s23, 512  ;;  %p1985_p1 = scmp.lt.s32.totalorder %s1549_s23, %s1549_s23 }
 0x35b   :  { %1867 = vmatmul.mubr.msk.f32.gmra.mrb[14].mxu1 %vm48_vm1, %v1979_v23  ;;  %p1981_p0 = scmp.ne.s32.totalorder %s1549_s23, %s1980_s24  ;;  %p1986_p2 = scmp.lt.s32.totalorder %s1980_s24, %s1980_s24 }
 0x35c   :  { %1871 = vmatprep.mubr.msk.f32.mxu1 %vm48_vm1, %v1406_v22 }
 0x35d   :  { %p1987_p3 = por %p1986_p2, %p1985_p1 }
 0x35f   :  { %1872 = vmatmul.mubr.msk.f32.vlgmr.msra.gmra.mrb[16].mxu1 %vm48_vm1, %v1407_v24  ;;  %p1988_p4 = pnand %p1987_p3, %p1981_p0 }
 0x360   :  { %1874 = vmatprep.mubr.msk.f32.mxu1 %vm48_vm1, %v1408_v28 }
 0x363   :  { %1875 = vmatmul.mubr.msk.f32.gmra.mrb[18].mxu1 %vm48_vm1, %v1409_v25 }
 0x42a   :  { %v1865_v26 = vpop.f32.mrb[12].mxu1 }
 0x42b   :  { %v1387_v27 = vpop.f32.mrb[13].mxu1  ;;  %v1532_v34 = vmul.f32 %v1865_v26, %v1075_v50 }
 0x42c   :  { %v1531_v37 = vmul.f32 %v1387_v27, %v1074_v47 }
 0x42e   :  { %v1868_v29 = vpop.f32.mrb[14].mxu1 }
 0x42f   :  { %v1397_v30 = vpop.f32.mrb[15].mxu1  ;;  %v1534_v46 = vmul.f32 %v1868_v29, %v1077_v55 }
 0x430   :  { %v1533_v42 = vmul.f32 %v1397_v30, %v1076_v54 }
 0x432   :  { %v1873_v33 = vpop.f32.mrb[16].mxu1 }
 0x433   :  { %v1518_v35 = vadd.f32 %v1873_v33, %v1422_v31  ;;  %v1512_v36 = vpop.f32.mrb[17].mxu1 }
 0x434   :  { %v1513_v38 = vadd.f32 %v1512_v36, %v1417_v32 }
 0x435   :  { %v1536_v39 = vadd.f32 %v1532_v34, %v1518_v35 }
 0x436   :  { %v1535_v41 = vadd.f32 %v1531_v37, %v1513_v38  ;;  %v1876_v44 = vpop.f32.mrb[18].mxu1 }
 0x437   :  { %1540 = vst [vmem:[#allocation2 + $0x8] sm:$0xff] %v1536_v39  ;;  %v1528_v48 = vadd.f32 %v1876_v44, %v1432_v40  ;;  %v1522_v49 = vpop.f32.mrb[19].mxu1 }
 0x438   :  { %1539 = vst [vmem:[#allocation2] sm:$0xff] %v1535_v41  ;;  %v1523_v43 = vadd.f32 %v1522_v49, %v1427_v45 }
 0x439   :  { %v1538_v47 = vadd.f32 %v1534_v46, %v1528_v48 }
 0x43a   :  { %v1537_v50 = vadd.f32 %v1533_v42, %v1523_v43 }
 0x43b   :  { %1542 = vst [vmem:[#allocation2 + $0x18] sm:$0xff] %v1538_v47 }
 0x43c   :  { %1541 = vst [vmem:[#allocation2 + $0x10] sm:$0xff] %v1537_v50 }
 0x43d   :  { %1991 = shalt.err (!%p1988_p4)
}
 0x43e   :  { %s1992_s27 = scalar_lea.hbm %s2395_s8, 512 }
 0x43f   :  { %p1993_p5 = scmp.ne.s32.totalorder %s2395_s8, %s1992_s27  ;;  %p1996_p6 = scmp.lt.u32.totalorder %s1992_s27, %s2395_s8 }
 0x441   :  { %p1998_p7 = pnand %p1996_p6, %p1993_p5 }
 0x443   :  { %2001 = shalt.err (!%p1998_p7)
}
 0x444   :  { %s2014_s10 = smov 128   ;;  %s2015_s11 = smov 8  }
 0x445   :  { %1554 = dma.vmem_to_hbm [thread:$0]  %s1549_s23, 512, %s2395_s8, [#allocation3], %s2014_s10, %s2014_s10, %s2015_s11  }
 0x446   :  { %2002 = dma.done.wait [#allocation3], 512  }
 0x447   :  { %2003 = vsyncadd [#allocation3], 4294966784 }
 0x448   :  { %1558 = vsyncpa [#allocation3], 1 }

</bundles_post_ra>
